<compile_context>
chip_gen: v6e
topology: v6e:2x2x1
jax: 0.10.0
libtpu: 0.0.40
codegen_flags: <defaults>
</compile_context>

<pallas_src>
import functools
import math

import numpy as np
import jax
import jax.numpy as jnp
from jax.experimental import pallas as pl
from jax.experimental.pallas import tpu as pltpu

ALPHA_LIM = (float(np.exp(-1.0 / 5.0)), float(np.exp(-1.0 / 25.0)))
BETA_LIM = (float(np.exp(-1.0 / 30.0)), float(np.exp(-1.0 / 120.0)))
A_LIM = (-1.0, 1.0)
B_LIM = (0.0, 2.0)
BN_EPS = 1e-5

_LANE = 128
_SUBLANE = 8


def _round_up(x, m):
    return (x + m - 1) // m * m


def _divisor_at_most(n, cap):
    """Largest divisor of n that is <= cap (>= 1)."""
    cap = int(max(1, min(n, cap)))
    for d in range(cap, 0, -1):
        if n % d == 0:
            return d
    return 1


def _vmem_config():
    """Generation-aware (v5e/v6e: 128 MiB, v7x: 64 MiB/TC) VMEM limit and a
    working-set budget used for tile sizing (leaves pipeline headroom)."""
    try:
        phys = int(pltpu.get_tpu_info().vmem_capacity_bytes)
    except Exception:  # pragma: no cover - conservative fallback
        phys = 128 * 1024 * 1024
    limit = min(int(phys * 3 // 4), 100 * 1024 * 1024)   # 96 MiB v5e/v6e, 48 MiB v7x
    budget = int(limit * 0.55)                            # ~52 MiB / ~26 MiB target
    return limit, budget


# ---------------------------------------------------------------------------
# Kernel 1: bf16 GEMM (x @ W^T) + masked per-tile BatchNorm statistics
# ---------------------------------------------------------------------------
def _gemm_stats_kernel(x_ref, wt_ref, rmask_ref, y_ref, sum_ref, sq_ref):
    # f32 MXU accumulate; stats are taken from the f32 value, y stored as bf16.
    y = jnp.dot(x_ref[...], wt_ref[...], preferred_element_type=jnp.float32)
    y_ref[...] = y.astype(y_ref.dtype)
    ym = y * rmask_ref[...]                       # (tr,Ip) * (tr,1): drop padded batch rows
    sum_ref[0] = jnp.sum(ym, axis=0, keepdims=True)
    sq_ref[0] = jnp.sum(ym * ym, axis=0, keepdims=True)


def _pick_gemm_row_tile(T, B_pad, Jp, Ip, budget):
    """Row tile = nt * B_pad with nt | T (no flat-row padding, no slice copy);
    sized to the VMEM budget and kept to >= 2 grid steps when T >= 2."""
    budget_eff = max(budget - 4 * Jp * Ip, budget // 4)   # resident (dbl-buffered) weight
    per_row = 4 * Jp + 16 * Ip                            # bf16 x/y bufs + live f32 values
    nt = _divisor_at_most(T, max(1, budget_eff // per_row) // max(B_pad, 1))
    if T >= 2:                                            # >=2 tiles: v7x megacore + pipelining
        nt = min(nt, _divisor_at_most(T, T // 2))
    return nt * B_pad, T // nt


def _gemm_and_stats(x2, wt, *, T, B_pad, B_real, budget, vmem_limit):
    """x2: (T*B_pad, Jp) bf16, wt: (Jp, Ip) bf16
       -> y (T*B_pad, Ip) bf16, mean (Ip,), inv_std (Ip,)."""
    R, Jp = x2.shape
    Ip = wt.shape[1]
    tr, n_tiles = _pick_gemm_row_tile(T, B_pad, Jp, Ip, budget)

    # row-validity mask (tile-periodic because tr % B_pad == 0): 1.0 on real
    # batch rows, 0.0 on padded ones -> exact BN stats over B_real*T samples.
    rmask = (jnp.arange(tr) % B_pad < B_real).astype(jnp.float32).reshape(tr, 1)

    y, psum, psq = pl.pallas_call(
        _gemm_stats_kernel,
        grid=(n_tiles,),
        in_specs=[pl.BlockSpec((tr, Jp), lambda r: (r, 0)),
                  pl.BlockSpec((Jp, Ip), lambda r: (0, 0)),
                  pl.BlockSpec((tr, 1), lambda r: (0, 0))],
        out_specs=[pl.BlockSpec((tr, Ip), lambda r: (r, 0)),
                   pl.BlockSpec((1, 1, Ip), lambda r: (r, 0, 0)),
                   pl.BlockSpec((1, 1, Ip), lambda r: (r, 0, 0))],
        out_shape=[jax.ShapeDtypeStruct((R, Ip), jnp.bfloat16),
                   jax.ShapeDtypeStruct((n_tiles, 1, Ip), jnp.float32),
                   jax.ShapeDtypeStruct((n_tiles, 1, Ip), jnp.float32)],
        compiler_params=pltpu.CompilerParams(
            dimension_semantics=("parallel",),
            vmem_limit_bytes=vmem_limit),
    )(x2, wt, rmask)

    inv_n = 1.0 / float(B_real * T)               # divide by REAL sample count
    mean = jnp.sum(psum[:, 0, :], axis=0) * inv_n
    ex2 = jnp.sum(psq[:, 0, :], axis=0) * inv_n
    var = jnp.maximum(ex2 - mean * mean, 0.0)     # biased var (training BN)
    inv_std = jax.lax.rsqrt(var + BN_EPS)
    return y, mean, inv_std


# ---------------------------------------------------------------------------
# Kernel 2: BN normalize + adaptive-LIF recurrence, time on the grid
# ---------------------------------------------------------------------------
def _adlif_recurrence_kernel(y_ref, par_ref, o_ref, u_ref, w_ref, s_ref, *,
                             theta, cell_type):
    t = pl.program_id(1)

    @pl.when(t == 0)
    def _():                                      # fresh state per batch tile
        u_ref[...] = jnp.zeros_like(u_ref)
        w_ref[...] = jnp.zeros_like(w_ref)
        s_ref[...] = jnp.zeros_like(s_ref)

    par = par_ref[...]                            # (8, Ip) f32, rows broadcast over sublanes
    alpha = par[0:1, :]
    beta = par[1:2, :]
    a = par[2:3, :]
    b = par[3:4, :]
    scale = par[4:5, :]                           # inv_std
    shift = par[5:6, :]                           # mean * inv_std
    omb = par[6:7, :]                             # 1 - beta
    bth = par[7:8, :]                             # beta * theta

    # BN-normalized input for this timestep (f32 math: no bf16 VPU on v5e).
    xt = y_ref[...].astype(jnp.float32) * scale - shift

    Ut = u_ref[...]
    Wt = w_ref[...]
    St = s_ref[...]

    Wt = alpha * Wt + a * Ut + b * St
    if cell_type == "soft":
        Ut = beta * Ut - bth * St + omb * (xt - Wt)
        St = (Ut >= theta).astype(jnp.float32)
    else:                                         # hard reset, U0 == 0
        Ut = beta * Ut + omb * (xt - Wt)
        spiked = Ut >= theta
        St = spiked.astype(jnp.float32)
        Ut = jnp.where(spiked, 0.0, Ut)

    u_ref[...] = Ut
    w_ref[...] = Wt
    s_ref[...] = St
    o_ref[...] = St.astype(o_ref.dtype)           # bf16 spikes (exact 0/1)


def _adlif_recurrence(y2, pblock, *, T, B_pad, BT, theta, cell_type, vmem_limit):
    Ip = y2.shape[-1]
    n_bt = B_pad // BT
    kern = functools.partial(_adlif_recurrence_kernel, theta=float(theta),
                             cell_type=cell_type)
    return pl.pallas_call(
        kern,
        grid=(n_bt, T),                           # batch parallel (megacore), time sequential
        in_specs=[pl.BlockSpec((BT, Ip), lambda bi, t: (t * n_bt + bi, 0)),
                  pl.BlockSpec((8, Ip), lambda bi, t: (0, 0))],
        out_specs=pl.BlockSpec((BT, Ip), lambda bi, t: (t * n_bt + bi, 0)),
        out_shape=jax.ShapeDtypeStruct((T * B_pad, Ip), jnp.bfloat16),
        scratch_shapes=[pltpu.VMEM((BT, Ip), jnp.float32)] * 3,   # U, W, S state
        compiler_params=pltpu.CompilerParams(
            dimension_semantics=("parallel", "arbitrary"),
            vmem_limit_bytes=vmem_limit),
    )(y2, pblock)


# ---------------------------------------------------------------------------
# Layer / model wrappers
# ---------------------------------------------------------------------------
def prepare_layer_params(p, Jp, Ip):
    """Pad + pre-transpose + pre-cast static per-layer tensors (done once)."""
    I, J = p["W"].shape
    wt = jnp.pad(p["W"].T.astype(jnp.bfloat16), ((0, Jp - J), (0, Ip - I)))

    def pad_vec(v):
        return jnp.pad(v.astype(jnp.float32), (0, Ip - I))

    return dict(wt=wt, alpha=pad_vec(p["alpha"]), beta=pad_vec(p["beta"]),
                a=pad_vec(p["a"]), b=pad_vec(p["b"]))


def _param_block(prep, mean, inv_std, theta):
    """(8, Ip) f32 parameter block: per-call clamping (as in PyTorch forward)
    plus loop-invariant combinations pre-computed once."""
    alpha = jnp.clip(prep["alpha"], ALPHA_LIM[0], ALPHA_LIM[1])
    beta = jnp.clip(prep["beta"], BETA_LIM[0], BETA_LIM[1])
    a = jnp.clip(prep["a"], A_LIM[0], A_LIM[1])
    b = jnp.clip(prep["b"], B_LIM[0], B_LIM[1])
    rows = [alpha, beta, a, b, inv_std, mean * inv_std,
            1.0 - beta, beta * float(theta)]
    return jnp.stack(rows, axis=0).astype(jnp.float32)


def adlmlif_layer(h, prep, *, B_real, B_pad, BT, T, theta, cell_type,
                  vmem_limit, budget):
    """One adLMLIFLayer: F.linear -> BatchNorm1d (batch stats) -> adaptive LIF.
    h: (T*B_pad, Jp) bf16 spikes -> (T*B_pad, Ip) bf16 spikes."""
    y2, mean, inv_std = _gemm_and_stats(h, prep["wt"], T=T, B_pad=B_pad,
                                        B_real=B_real, budget=budget,
                                        vmem_limit=vmem_limit)
    pblock = _param_block(prep, mean, inv_std, theta)
    return _adlif_recurrence(y2, pblock, T=T, B_pad=B_pad, BT=BT,
                             theta=theta, cell_type=cell_type,
                             vmem_limit=vmem_limit)


def _pick_batch_tile(B, Ip_max, budget):
    """Batch padding / batch tile for the recurrence.  Per batch row the
    kernel holds ~44*Ip bytes (double-buffered bf16 y/o blocks + 3 f32 state
    planes + live f32 temporaries); BT is capped by that budget and, when the
    batch is large enough, split into >= 2 tiles so both v7x TCs get work."""
    b8 = _round_up(max(B, 1), _SUBLANE)
    per_row = 44 * Ip_max
    bt_cap = max(_SUBLANE, (budget // per_row) // _SUBLANE * _SUBLANE)
    if b8 >= 2 * _SUBLANE:
        bt_cap = min(bt_cap, _round_up((b8 + 1) // 2, _SUBLANE))
    bt = max(_SUBLANE, min(b8, bt_cap))
    b_pad = _round_up(b8, bt)                     # BT divides B_pad exactly
    return b_pad, bt


def init_layer_params(key, input_dim, hidden_size):
    """Deterministic re-implementation of adLMLIFLayer.__init__ inits."""
    kW, ka, kb, kA, kB = jax.random.split(key, 5)
    # kaiming_uniform_(W, a=sqrt(5)) -> U(-1/sqrt(fan_in), 1/sqrt(fan_in))
    bound = 1.0 / math.sqrt(input_dim)
    W = jax.random.uniform(kW, (hidden_size, input_dim), jnp.float32,
                           -bound, bound)
    alpha = jax.random.uniform(ka, (hidden_size,), jnp.float32,
                               ALPHA_LIM[0], ALPHA_LIM[1])
    beta = jax.random.uniform(kb, (hidden_size,), jnp.float32,
                              BETA_LIM[0], BETA_LIM[1])
    a = jax.random.uniform(kA, (hidden_size,), jnp.float32, A_LIM[0], A_LIM[1])
    b = jax.random.uniform(kB, (hidden_size,), jnp.float32, B_LIM[0], B_LIM[1])
    return dict(W=W, alpha=alpha, beta=beta, a=a, b=b)


def adlmlif_snn_forward(x, layer_params, *, threshold, cell_type):
    """adLMLIFSNN.forward LIF stack.  x: (B, Tseq, J) -> (B, Tseq, out_dim)."""
    B, Tseq, J = x.shape
    dims = [J] + [p["W"].shape[0] for p in layer_params]
    pads = [_round_up(d, _LANE) for d in dims]
    vmem_limit, budget = _vmem_config()
    B_pad, BT = _pick_batch_tile(B, max(pads), budget)

    preps = [prepare_layer_params(p, pads[i], pads[i + 1])
             for i, p in enumerate(layer_params)]

    # flat time-major, batch/feature padded, bf16 (spikes are exactly 0/1)
    h = jnp.transpose(x, (1, 0, 2)).astype(jnp.bfloat16)
    h = jnp.pad(h, ((0, 0), (0, B_pad - B), (0, pads[0] - J)))
    h = h.reshape(Tseq * B_pad, pads[0])

    for prep in preps:
        h = adlmlif_layer(h, prep, B_real=B, B_pad=B_pad, BT=BT, T=Tseq,
                          theta=threshold, cell_type=cell_type,
                          vmem_limit=vmem_limit, budget=budget)
        # TODO(synk): nn.Dropout on non-readout layers omitted (inference
        # semantics; training-mode dropout is stochastic).

    out = h.reshape(Tseq, B_pad, pads[-1])[:, :B, :dims[-1]].astype(jnp.float32)
    return jnp.transpose(out, (1, 0, 2))


if __name__ == "__main__":
    key = jax.random.PRNGKey(0)
    B, T, J, H = 2, 8, 16, 32          # batch, seq, input_dim(per-bin), hidden
    n_layers = 3
    threshold = 1.0
    cell_type = "soft"
    Tseq = T + 1                        # the spikoder emits length-(T+1) sequences

    # TODO(synk): create_spikoder / self.spikoder is external, undefined code;
    # the kernel stack consumes the already-encoded (B, T+1, J) spike tensor.
    kx, *lkeys = jax.random.split(key, 1 + n_layers)
    x = (jax.random.uniform(kx, (B, Tseq, J), jnp.float32) > 0.5
         ).astype(jnp.float32)

    params = []
    in_dim = J
    for i in range(n_layers - 1):
        params.append(init_layer_params(lkeys[i], in_dim, H))   # readout=False
        in_dim = H
    params.append(init_layer_params(lkeys[-1], H, J))           # readout=True

    fwd = jax.jit(functools.partial(adlmlif_snn_forward,
                                    threshold=threshold, cell_type=cell_type))
    out = jax.block_until_ready(fwd(x, params))
    assert out.shape == (B, Tseq, J), out.shape
    if float(jnp.mean(out)) < 0.001:
        print("Warning! Low activity in output!")
    print("KERNEL_OK")
</pallas_src>

<mosaic_0001>
module attributes {stable_mosaic.version = 11 : i64} {
  func.func @_gemm_stats_kernel(%arg0: i32, %arg1: memref<24x128xbf16, #tpu.memory_space<vmem>>, %arg2: memref<128x128xbf16, #tpu.memory_space<vmem>>, %arg3: memref<24x1xf32, #tpu.memory_space<vmem>>, %arg4: memref<24x128xbf16, #tpu.memory_space<vmem>>, %arg5: memref<1x1x128xf32, #tpu.memory_space<vmem>>, %arg6: memref<1x1x128xf32, #tpu.memory_space<vmem>>) attributes {dimension_semantics = [#tpu.dimension_semantics<parallel>], iteration_bounds = array<i64: 3>, scalar_prefetch = 0 : i64, scratch_operands = 0 : i64, tpu.core_type = #tpu.core_type<tc>, window_params = [{transform_indices = @transform_0, window_bounds = array<i64: 24, 128>}, {pipeline_mode = #tpu.pipeline_mode<synchronous>, transform_indices = @transform_1, window_bounds = array<i64: 128, 128>}, {pipeline_mode = #tpu.pipeline_mode<synchronous>, transform_indices = @transform_2, window_bounds = array<i64: 24, 1>}, {transform_indices = @transform_3, window_bounds = array<i64: 24, 128>}, {transform_indices = @transform_4, window_bounds = array<i64: 1, 1, 128>}, {transform_indices = @transform_5, window_bounds = array<i64: 1, 1, 128>}]} {
    %c0 = arith.constant 0 : index
    %c0_0 = arith.constant 0 : index
    %0 = vector.load %arg1[%c0, %c0_0] : memref<24x128xbf16, #tpu.memory_space<vmem>>, vector<24x128xbf16>
    %c0_1 = arith.constant 0 : index
    %c0_2 = arith.constant 0 : index
    %1 = vector.load %arg2[%c0_1, %c0_2] : memref<128x128xbf16, #tpu.memory_space<vmem>>, vector<128x128xbf16>
    %cst = arith.constant dense<0.000000e+00> : vector<24x128xf32>
    %2 = tpu.matmul %0, %1, %cst {dimension_numbers = #tpu.dot_dimension_numbers<[1], [0], [0], [1], [0, 0, 1, 1], [], []>} : vector<24x128xbf16>, vector<128x128xbf16>, vector<24x128xf32> -> vector<24x128xf32>
    %3 = arith.truncf %2 : vector<24x128xf32> to vector<24x128xbf16>
    %c0_3 = arith.constant 0 : index
    %c0_4 = arith.constant 0 : index
    %4 = vector.load %arg4[%c0_3, %c0_4] : memref<24x128xbf16, #tpu.memory_space<vmem>>, vector<24x128xbf16>
    tpu.vector_store %arg4[%c0_3, %c0_4], %3 {strides = array<i32>} : memref<24x128xbf16, #tpu.memory_space<vmem>>, vector<24x128xbf16>,
    %c0_5 = arith.constant 0 : index
    %c0_6 = arith.constant 0 : index
    %5 = vector.load %arg3[%c0_5, %c0_6] : memref<24x1xf32, #tpu.memory_space<vmem>>, vector<24x1xf32>
    %6 = vector.broadcast %5 : vector<24x1xf32> to vector<24x128xf32>
    %7 = arith.mulf %2, %6 : vector<24x128xf32>
    %cst_7 = arith.constant dense<0.000000e+00> : vector<128xf32>
    %8 = vector.multi_reduction <add>, %7, %cst_7 [0] : vector<24x128xf32> to vector<128xf32>
    %9 = vector.shape_cast %8 : vector<128xf32> to vector<1x128xf32>
    %c0_8 = arith.constant 0 : index
    %c0_9 = arith.constant 0 : index
    %c0_10 = arith.constant 0 : index
    %10 = vector.load %arg5[%c0_8, %c0_9, %c0_10] : memref<1x1x128xf32, #tpu.memory_space<vmem>>, vector<1x1x128xf32>
    %11 = vector.shape_cast %10 : vector<1x1x128xf32> to vector<1x128xf32>
    %12 = vector.shape_cast %9 : vector<1x128xf32> to vector<1x1x128xf32>
    tpu.vector_store %arg5[%c0_8, %c0_9, %c0_10], %12 {strides = array<i32>} : memref<1x1x128xf32, #tpu.memory_space<vmem>>, vector<1x1x128xf32>,
    %13 = arith.mulf %7, %7 : vector<24x128xf32>
    %cst_11 = arith.constant dense<0.000000e+00> : vector<128xf32>
    %14 = vector.multi_reduction <add>, %13, %cst_11 [0] : vector<24x128xf32> to vector<128xf32>
    %15 = vector.shape_cast %14 : vector<128xf32> to vector<1x128xf32>
    %c0_12 = arith.constant 0 : index
    %c0_13 = arith.constant 0 : index
    %c0_14 = arith.constant 0 : index
    %16 = vector.load %arg6[%c0_12, %c0_13, %c0_14] : memref<1x1x128xf32, #tpu.memory_space<vmem>>, vector<1x1x128xf32>
    %17 = vector.shape_cast %16 : vector<1x1x128xf32> to vector<1x128xf32>
    %18 = vector.shape_cast %15 : vector<1x128xf32> to vector<1x1x128xf32>
    tpu.vector_store %arg6[%c0_12, %c0_13, %c0_14], %18 {strides = array<i32>} : memref<1x1x128xf32, #tpu.memory_space<vmem>>, vector<1x1x128xf32>,
    return
  }
  func.func @transform_0(%arg0: i32) -> (i32, i32) {
    %c0_i32 = arith.constant 0 : i32
    %c0_i32_0 = arith.constant 0 : i32
    return %arg0, %c0_i32 : i32, i32
  }
  func.func @transform_1(%arg0: i32) -> (i32, i32) {
    %c0_i32 = arith.constant 0 : i32
    %c0_i32_0 = arith.constant 0 : i32
    %c0_i32_1 = arith.constant 0 : i32
    return %c0_i32, %c0_i32_0 : i32, i32
  }
  func.func @transform_2(%arg0: i32) -> (i32, i32) {
    %c0_i32 = arith.constant 0 : i32
    %c0_i32_0 = arith.constant 0 : i32
    %c0_i32_1 = arith.constant 0 : i32
    return %c0_i32, %c0_i32_0 : i32, i32
  }
  func.func @transform_3(%arg0: i32) -> (i32, i32) {
    %c0_i32 = arith.constant 0 : i32
    %c0_i32_0 = arith.constant 0 : i32
    return %arg0, %c0_i32 : i32, i32
  }
  func.func @transform_4(%arg0: i32) -> (i32, i32, i32) {
    %c0_i32 = arith.constant 0 : i32
    %c0_i32_0 = arith.constant 0 : i32
    %c0_i32_1 = arith.constant 0 : i32
    return %arg0, %c0_i32, %c0_i32_0 : i32, i32, i32
  }
  func.func @transform_5(%arg0: i32) -> (i32, i32, i32) {
    %c0_i32 = arith.constant 0 : i32
    %c0_i32_0 = arith.constant 0 : i32
    %c0_i32_1 = arith.constant 0 : i32
    return %arg0, %c0_i32, %c0_i32_0 : i32, i32, i32
  }
}

module attributes {stable_mosaic.version = 11 : i64} {
  func.func @_adlif_recurrence_kernel(%arg0: i32, %arg1: i32, %arg2: memref<8x128xbf16, #tpu.memory_space<vmem>>, %arg3: memref<8x128xf32, #tpu.memory_space<vmem>>, %arg4: memref<8x128xbf16, #tpu.memory_space<vmem>>, %arg5: memref<8x128xf32, #tpu.memory_space<vmem>>, %arg6: memref<8x128xf32, #tpu.memory_space<vmem>>, %arg7: memref<8x128xf32, #tpu.memory_space<vmem>>) attributes {dimension_semantics = [#tpu.dimension_semantics<parallel>, #tpu.dimension_semantics<arbitrary>], iteration_bounds = array<i64: 1, 9>, scalar_prefetch = 0 : i64, scratch_operands = 3 : i64, tpu.core_type = #tpu.core_type<tc>, window_params = [{transform_indices = @transform_0, window_bounds = array<i64: 8, 128>}, {pipeline_mode = #tpu.pipeline_mode<synchronous>, transform_indices = @transform_1, window_bounds = array<i64: 8, 128>}, {transform_indices = @transform_2, window_bounds = array<i64: 8, 128>}]} {
    %c0_i32 = arith.constant 0 : i32
    %0 = arith.cmpi eq, %arg1, %c0_i32 : i32
    %1 = arith.extui %0 : i1 to i32
    %c0_i32_0 = arith.constant 0 : i32
    %2 = arith.cmpi ne, %1, %c0_i32_0 : i32
    scf.if %2 {
      %cst_18 = arith.constant 0.000000e+00 : f32
      %47 = vector.broadcast %cst_18 : f32 to vector<8x128xf32>
      %c0_19 = arith.constant 0 : index
      %c0_20 = arith.constant 0 : index
      %48 = vector.load %arg5[%c0_19, %c0_20] : memref<8x128xf32, #tpu.memory_space<vmem>>, vector<8x128xf32>
      tpu.vector_store %arg5[%c0_19, %c0_20], %47 {strides = array<i32>} : memref<8x128xf32, #tpu.memory_space<vmem>>, vector<8x128xf32>,
      %cst_21 = arith.constant 0.000000e+00 : f32
      %49 = vector.broadcast %cst_21 : f32 to vector<8x128xf32>
      %c0_22 = arith.constant 0 : index
      %c0_23 = arith.constant 0 : index
      %50 = vector.load %arg6[%c0_22, %c0_23] : memref<8x128xf32, #tpu.memory_space<vmem>>, vector<8x128xf32>
      tpu.vector_store %arg6[%c0_22, %c0_23], %49 {strides = array<i32>} : memref<8x128xf32, #tpu.memory_space<vmem>>, vector<8x128xf32>,
      %cst_24 = arith.constant 0.000000e+00 : f32
      %51 = vector.broadcast %cst_24 : f32 to vector<8x128xf32>
      %c0_25 = arith.constant 0 : index
      %c0_26 = arith.constant 0 : index
      %52 = vector.load %arg7[%c0_25, %c0_26] : memref<8x128xf32, #tpu.memory_space<vmem>>, vector<8x128xf32>
      tpu.vector_store %arg7[%c0_25, %c0_26], %51 {strides = array<i32>} : memref<8x128xf32, #tpu.memory_space<vmem>>, vector<8x128xf32>,
    } else {
    }
    %c0 = arith.constant 0 : index
    %c0_1 = arith.constant 0 : index
    %3 = vector.load %arg3[%c0, %c0_1] : memref<8x128xf32, #tpu.memory_space<vmem>>, vector<8x128xf32>
    %4 = vector.extract_strided_slice %3 {offsets = [0, 0], sizes = [1, 128], strides = [1, 1]} : vector<8x128xf32> to vector<1x128xf32>
    %5 = vector.extract_strided_slice %3 {offsets = [1, 0], sizes = [1, 128], strides = [1, 1]} : vector<8x128xf32> to vector<1x128xf32>
    %6 = vector.extract_strided_slice %3 {offsets = [2, 0], sizes = [1, 128], strides = [1, 1]} : vector<8x128xf32> to vector<1x128xf32>
    %7 = vector.extract_strided_slice %3 {offsets = [3, 0], sizes = [1, 128], strides = [1, 1]} : vector<8x128xf32> to vector<1x128xf32>
    %8 = vector.extract_strided_slice %3 {offsets = [4, 0], sizes = [1, 128], strides = [1, 1]} : vector<8x128xf32> to vector<1x128xf32>
    %9 = vector.extract_strided_slice %3 {offsets = [5, 0], sizes = [1, 128], strides = [1, 1]} : vector<8x128xf32> to vector<1x128xf32>
    %10 = vector.extract_strided_slice %3 {offsets = [6, 0], sizes = [1, 128], strides = [1, 1]} : vector<8x128xf32> to vector<1x128xf32>
    %11 = vector.extract_strided_slice %3 {offsets = [7, 0], sizes = [1, 128], strides = [1, 1]} : vector<8x128xf32> to vector<1x128xf32>
    %c0_2 = arith.constant 0 : index
    %c0_3 = arith.constant 0 : index
    %12 = vector.load %arg2[%c0_2, %c0_3] : memref<8x128xbf16, #tpu.memory_space<vmem>>, vector<8x128xbf16>
    %13 = arith.extf %12 : vector<8x128xbf16> to vector<8x128xf32>
    %14 = vector.broadcast %8 : vector<1x128xf32> to vector<8x128xf32>
    %15 = arith.mulf %13, %14 : vector<8x128xf32>
    %16 = vector.broadcast %9 : vector<1x128xf32> to vector<8x128xf32>
    %17 = arith.subf %15, %16 : vector<8x128xf32>
    %c0_4 = arith.constant 0 : index
    %c0_5 = arith.constant 0 : index
    %18 = vector.load %arg5[%c0_4, %c0_5] : memref<8x128xf32, #tpu.memory_space<vmem>>, vector<8x128xf32>
    %c0_6 = arith.constant 0 : index
    %c0_7 = arith.constant 0 : index
    %19 = vector.load %arg6[%c0_6, %c0_7] : memref<8x128xf32, #tpu.memory_space<vmem>>, vector<8x128xf32>
    %c0_8 = arith.constant 0 : index
    %c0_9 = arith.constant 0 : index
    %20 = vector.load %arg7[%c0_8, %c0_9] : memref<8x128xf32, #tpu.memory_space<vmem>>, vector<8x128xf32>
    %21 = vector.broadcast %4 : vector<1x128xf32> to vector<8x128xf32>
    %22 = arith.mulf %21, %19 : vector<8x128xf32>
    %23 = vector.broadcast %6 : vector<1x128xf32> to vector<8x128xf32>
    %24 = arith.mulf %23, %18 : vector<8x128xf32>
    %25 = arith.addf %22, %24 : vector<8x128xf32>
    %26 = vector.broadcast %7 : vector<1x128xf32> to vector<8x128xf32>
    %27 = arith.mulf %26, %20 : vector<8x128xf32>
    %28 = arith.addf %25, %27 : vector<8x128xf32>
    %29 = vector.broadcast %5 : vector<1x128xf32> to vector<8x128xf32>
    %30 = arith.mulf %29, %18 : vector<8x128xf32>
    %31 = vector.broadcast %11 : vector<1x128xf32> to vector<8x128xf32>
    %32 = arith.mulf %31, %20 : vector<8x128xf32>
    %33 = arith.subf %30, %32 : vector<8x128xf32>
    %34 = arith.subf %17, %28 : vector<8x128xf32>
    %35 = vector.broadcast %10 : vector<1x128xf32> to vector<8x128xf32>
    %36 = arith.mulf %35, %34 : vector<8x128xf32>
    %37 = arith.addf %33, %36 : vector<8x128xf32>
    %cst = arith.constant 1.000000e+00 : f32
    %38 = vector.broadcast %cst : f32 to vector<8x128xf32>
    %39 = arith.cmpf oge, %37, %38 : vector<8x128xf32>
    %40 = arith.extui %39 : vector<8x128xi1> to vector<8x128xi32>
    %41 = arith.sitofp %40 : vector<8x128xi32> to vector<8x128xf32>
    %c0_10 = arith.constant 0 : index
    %c0_11 = arith.constant 0 : index
    %42 = vector.load %arg5[%c0_10, %c0_11] : memref<8x128xf32, #tpu.memory_space<vmem>>, vector<8x128xf32>
    tpu.vector_store %arg5[%c0_10, %c0_11], %37 {strides = array<i32>} : memref<8x128xf32, #tpu.memory_space<vmem>>, vector<8x128xf32>,
    %c0_12 = arith.constant 0 : index
    %c0_13 = arith.constant 0 : index
    %43 = vector.load %arg6[%c0_12, %c0_13] : memref<8x128xf32, #tpu.memory_space<vmem>>, vector<8x128xf32>
    tpu.vector_store %arg6[%c0_12, %c0_13], %28 {strides = array<i32>} : memref<8x128xf32, #tpu.memory_space<vmem>>, vector<8x128xf32>,
    %c0_14 = arith.constant 0 : index
    %c0_15 = arith.constant 0 : index
    %44 = vector.load %arg7[%c0_14, %c0_15] : memref<8x128xf32, #tpu.memory_space<vmem>>, vector<8x128xf32>
    tpu.vector_store %arg7[%c0_14, %c0_15], %41 {strides = array<i32>} : memref<8x128xf32, #tpu.memory_space<vmem>>, vector<8x128xf32>,
    %45 = arith.truncf %41 : vector<8x128xf32> to vector<8x128xbf16>
    %c0_16 = arith.constant 0 : index
    %c0_17 = arith.constant 0 : index
    %46 = vector.load %arg4[%c0_16, %c0_17] : memref<8x128xbf16, #tpu.memory_space<vmem>>, vector<8x128xbf16>
    tpu.vector_store %arg4[%c0_16, %c0_17], %45 {strides = array<i32>} : memref<8x128xbf16, #tpu.memory_space<vmem>>, vector<8x128xbf16>,
    return
  }
  func.func @transform_0(%arg0: i32, %arg1: i32) -> (i32, i32) {
    %c1_i32 = arith.constant 1 : i32
    %0 = arith.muli %arg1, %c1_i32 : i32
    %1 = arith.addi %0, %arg0 : i32
    %c0_i32 = arith.constant 0 : i32
    %c0_i32_0 = arith.constant 0 : i32
    return %1, %c0_i32 : i32, i32
  }
  func.func @transform_1(%arg0: i32, %arg1: i32) -> (i32, i32) {
    %c0_i32 = arith.constant 0 : i32
    %c0_i32_0 = arith.constant 0 : i32
    %c0_i32_1 = arith.constant 0 : i32
    return %c0_i32, %c0_i32_0 : i32, i32
  }
  func.func @transform_2(%arg0: i32, %arg1: i32) -> (i32, i32) {
    %c1_i32 = arith.constant 1 : i32
    %0 = arith.muli %arg1, %c1_i32 : i32
    %1 = arith.addi %0, %arg0 : i32
    %c0_i32 = arith.constant 0 : i32
    %c0_i32_0 = arith.constant 0 : i32
    return %1, %c0_i32 : i32, i32
  }
}

</mosaic_0001>

<bundles_post_ra>
// kernel: adlmlif_snn_forward.7
= control target key start
LH: loop header
LB: loop body
LE: loop exit
PB: predicated region body
PF: predicated region fallthrough
CT: control target
= control target key end

     0   :  { %s372_s9 = smov 0   ;;  %s374_s10 = smov 0   ;;  %s411_s0 = inlined_call_operand.vmem [shape: bf16[72,128], index: 0, kind: input, shape index: {}]   ;;  %s412_s1 = inlined_call_operand.vmem [shape: f32[8,128], index: 1, kind: input, shape index: {}]   ;;  %s413_s2 = inlined_call_operand.vmem [shape: bf16[72,128], index: 2, kind: output, shape index: {}]  }
   0x1   :  { %s376_s11 = smov 0  }
   0x2 LB: > { %s21_s12 = sadd.s32 1, %s349_s10  ;;  %p298_p0 = scmp.ge.s32.totalorder %s353_s11, 1  ;;  %s353_s11 = sphi %s376_s11, %s12_s11   ;;  %s349_s10 = sphi %s374_s10, %s415_s10   ;;  %s345_s9 = sphi %s372_s9, %s414_s9  }
   0x3   : > { %p22_p1 = scmp.ge.s32.totalorder %s21_s12, 9  ;;  %p129_p2 = scmp.lt.s32.totalorder %s353_s11, 10 }
   0x5   : > { %s417_s12 = smov (%p22_p1, %s21_s12), 0  ;;  %p130_p3 = pnand %p298_p0, %p129_p2 }
   0x6   : > { %p152_p4 = scmp.lt.s32.totalorder (!%p130_p3), %s345_s9, 8  ;;  %p301_p5 = scmp.ne.s32.totalorder (!%p130_p3), %s345_s9, 0 }
   0x7   : > { %133 = sbr.rel (%p130_p3) target bundleno = 46 (0x2e), region = 28 }
   0xc   : > { %s153_s13 = scalar_select %p152_p4, %s345_s9, 8 }
   0xd   : > { %166 = sbr.rel (%p301_p5) target bundleno = 21 (0x15), region = 32 }
   0xe   : > { %s299_s14 = sshll.u32 %s153_s13, 2 }
   0xf   : > { %s155_s17 = scalar_lea.vmem %s411_s0, %s299_s14  ;;  %s396_s20 = scalar_lea.vmem %s413_s2, %s299_s14 }
  0x12   : > { %v355_v0 = vmov 0.0  }
  0x13   : > { %167 = vst [vmem:[#allocation2] sm:$0xff] %v355_v0  ;;  %168 = vst [vmem:[#allocation3] sm:$0xff] %v355_v0 }
  0x14   : > { %169 = vst [vmem:[#allocation4] sm:$0xff] %v355_v0 }
  0x15 PF: > { %v171_v1 = vld [vmem:[%s155_s17] sm:$0xf]  ;;  %v173_v2 = vlaneseq  ;;  %v356_v38 = vmov 0.0  }
  0x16   : > { %v170_v4 = vld [vmem:[%s412_s1] sm:$0xff]  ;;  %v172_v5 = vunpack.c.l.bf16 %v171_v1 }
  0x17   : > { %v174_v3 = vshrl.u32 %v173_v2, 7 }
  0x19   : > { %v175_v6 = vsub.s32 4, %v174_v3  ;;  %v180_v7 = vsub.s32 5, %v174_v3  ;;  %v188_v8 = vsub.s32 0, %v174_v3  ;;  %v193_v9 = vsub.s32 2, %v174_v3 }
  0x1a   : > { %v183_v10 = vld [vmem:[#allocation2] sm:$0xff]  ;;  %v184_v11 = vld [vmem:[#allocation3] sm:$0xff]  ;;  %v199_v12 = vsub.s32 3, %v174_v3  ;;  %v205_v13 = vsub.s32 1, %v174_v3  ;;  %v210_v14 = vsub.s32 7, %v174_v3  ;;  %v217_v26 = vsub.s32 6, %v174_v3 }
  0x1b   : > { %v176_v15 = vrot.slane %v170_v4, %v175_v6  ;;  %v181_v16 = vrot.slane %v170_v4, %v180_v7  ;;  %v185_v17 = vld [vmem:[#allocation4] sm:$0xff]  ;;  %v189_v18 = vrot.slane %v170_v4, %v188_v8  ;;  %v194_v19 = vrot.slane %v170_v4, %v193_v9 }
  0x1c   : > { %v200_v20 = vrot.slane %v170_v4, %v199_v12  ;;  %v206_v21 = vrot.slane %v170_v4, %v205_v13  ;;  %v211_v22 = vrot.slane %v170_v4, %v210_v14  ;;  %v218_v33 = vrot.slane %v170_v4, %v217_v26 }
  0x1d   : > { %v177_v23 = vmul.f32 %v176_v15, %v172_v5  ;;  %v190_v24 = vmul.f32 %v189_v18, %v184_v11  ;;  %v195_v25 = vmul.f32 %v194_v19, %v183_v10 }
  0x1e   : > { %v201_v27 = vmul.f32 %v200_v20, %v185_v17  ;;  %v207_v30 = vmul.f32 %v206_v21, %v183_v10  ;;  %v212_v31 = vmul.f32 %v211_v22, %v185_v17 }
  0x1f   : > { %v182_v28 = vsub.f32 %v177_v23, %v181_v16  ;;  %v196_v29 = vadd.f32 %v195_v25, %v190_v24 }
  0x20   : > { %v213_v34 = vsub.f32 %v207_v30, %v212_v31 }
  0x21   : > { %v202_v32 = vadd.f32 %v201_v27, %v196_v29 }
  0x23   : > { %v214_v35 = vsub.f32 %v182_v28, %v202_v32  ;;  %225 = vst [vmem:[#allocation3] sm:$0xff] %v202_v32 }
  0x25   : > { %v219_v36 = vmul.f32 %v218_v33, %v214_v35 }
  0x27   : > { %v220_v37 = vadd.f32 %v219_v36, %v213_v34 }
  0x29   : > { %224 = vst [vmem:[#allocation2] sm:$0xff] %v220_v37  ;;  %vm221_vm0 = vcmp.ge.f32.partialorder %v220_v37, 1.0 }
  0x2a   : > { %v302_v39 = vsel %vm221_vm0, 1.0, %v356_v38 }
  0x2b   : > { %226 = vst [vmem:[#allocation4] sm:$0xff] %v302_v39  ;;  %v227_v40 = vpack.c.bf16 %v302_v39, %v302_v39 }
  0x2d   : > { %228 = vst [vmem:[%s396_s20] sm:$0xf] %v227_v40 }
  0x2e PF: > { %s12_s11 = sadd.s32 1, %s353_s11   ;;  %s414_s9 = smov %s349_s10 }
  0x2f   : > { %p9_p6 = scmp.ge.s32.totalorder %s12_s11, 11   ;;  %s415_s10 = smov %s417_s12 }
  0x31   :  { %11 = sbr.rel (!%p9_p6) target bundleno = 2 (0x2), region = 62 }

// kernel: adlmlif_snn_forward.6
= control target key start
LH: loop header
LB: loop body
LE: loop exit
PB: predicated region body
PF: predicated region fallthrough
CT: control target
= control target key end

     0   :  { %s655_s18 = smov 0   ;;  %s723_s0 = inlined_call_operand.vmem [shape: bf16[72,128], index: 0, kind: input, shape index: {}]   ;;  %s724_s1 = inlined_call_operand.vmem [shape: bf16[128,128], index: 1, kind: input, shape index: {}]   ;;  %s725_s2 = inlined_call_operand.vmem [shape: f32[24,1], index: 2, kind: input, shape index: {}]   ;;  %s726_s3 = inlined_call_operand.vmem [shape: bf16[72,128], index: 3, kind: output, shape index: {0}]   ;;  %s727_s4 = inlined_call_operand.vmem [shape: f32[3,1,128], index: 4, kind: output, shape index: {1}]   ;;  %s728_s5 = inlined_call_operand.vmem [shape: f32[3,1,128], index: 5, kind: output, shape index: {2}]  }
   0x1 LB: > { %s661_s19 = sadd.s32 4294967295, %s622_s18   ;;  %p539_p0 = scmp.ge.s32.totalorder %s622_s18, 1  ;;  %s622_s18 = sphi %s655_s18, %s16_s18  }
   0x2   : > { %p193_p1 = scmp.lt.s32.totalorder %s622_s18, 4 }
   0x4   : > { %p194_p2 = pnand %p539_p0, %p193_p1 }
   0x5   : > { %s227_s22 = smul.u32 (!%p194_p2), 3, %s661_s19  ;;  %p239_p4 = scmp.lt.s32.totalorder (!%p194_p2), %s661_s19, 2 }
   0x6   : > { %197 = sbr.rel (%p194_p2) target bundleno = 264 (0x108), region = 32 }
   0x7   : > { %p228_p3 = scmp.lt.s32.totalorder (!%p194_p2), %s227_s22, 8 }
   0xb   : > { %v606_v0 = vld [vmem:[%s724_s1 + $0x38] sm:$0xff]   ;;  %v607_v1 = vld [vmem:[%s724_s1 + $0x30] sm:$0xff]   ;;  %v624_v2 = vmov 0   ;;  %v608_v3 = vld [vmem:[%s724_s1 + $0x28] sm:$0xff]   ;;  %s730_s22 = smov (!%p228_p3, %s227_s22), 8  ;;  %s732_s19 = smov (!%p239_p4, %s661_s19), 2 }
   0xc   : > { %575 = vmatprep.subr.bf16.mxu0 %v606_v0  ;;  %604 = vset.pattern.permute.xlu0 %v624_v2  ;;  %s540_s27 = sshll.u32 %s730_s22, 2  ;;  %v609_v4 = vld [vmem:[%s724_s1 + $0x20] sm:$0xff]   ;;  %v389_v7 = vld [vmem:[%s725_s2 + $0x10] sm:$0xff]  ;;  %v388_v8 = vld [vmem:[%s725_s2 + $0x8] sm:$0xff]  ;;  %s241_s29 = scalar_lea.vmem %s727_s4, %s732_s19 }
   0xd   : > { %576 = vmatpush3.bf16.msra.mxu0 %v606_v0  ;;  %605 = vset.pattern.permute.xlu1 %v624_v2  ;;  %s231_s7 = scalar_lea.vmem %s723_s0, %s540_s27  ;;  %v387_v6 = vld [vmem:[%s725_s2] sm:$0xff]  ;;  %v610_v9 = vld [vmem:[%s724_s1 + $0x18] sm:$0xff]   ;;  %v611_v10 = vld [vmem:[%s724_s1 + $0x10] sm:$0xff]   ;;  %s237_s28 = scalar_lea.vmem %s726_s3, %s540_s27 }
   0xe   : > { %577 = vmatprep.subr.bf16.mxu0 %v607_v1  ;;  %v614_v5 = vld [vmem:[%s231_s7] sm:$0xff]   ;;  %392 = vperm.xlu0 %604, %v387_v6   ;;  %v612_v11 = vld [vmem:[%s724_s1 + $0x8] sm:$0xff]  }
   0xf   : > { %591 = vmatprep.mubr.bf16.mxu0 %v614_v5  ;;  %402 = vperm.xlu1 %605, %v389_v7   ;;  %v613_v12 = vld [vmem:[%s724_s1] sm:$0xff]   ;;  %v615_v13 = vld [vmem:[%s231_s7 + $0x8] ss:$0 sps:$4 sm:$0xff]   ;;  %s244_s7 = scalar_lea.vmem %s728_s5, %s732_s19 }
  0x11   : > { %578 = vmatpush3.bf16.msra.mxu0 %v607_v1 }
  0x12   : > { %579 = vmatprep.subr.bf16.mxu0 %v608_v3  ;;  %397 = vperm.xlu0 %604, %v388_v8  }
  0x15   : > { %580 = vmatpush3.bf16.msra.mxu0 %v608_v3 }
  0x16   : > { %581 = vmatprep.subr.bf16.mxu0 %v609_v4 }
  0x19   : > { %582 = vmatpush3.bf16.msra.mxu0 %v609_v4 }
  0x1a   : > { %583 = vmatprep.subr.bf16.mxu0 %v610_v9 }
  0x1d   : > { %584 = vmatpush3.bf16.msra.mxu0 %v610_v9 }
  0x1e   : > { %585 = vmatprep.subr.bf16.mxu0 %v611_v10 }
  0x21   : > { %586 = vmatpush3.bf16.msra.mxu0 %v611_v10 }
  0x22   : > { %587 = vmatprep.subr.bf16.mxu0 %v612_v11 }
  0x25   : > { %588 = vmatpush3.bf16.msra.mxu0 %v612_v11 }
  0x26   : > { %589 = vmatprep.subr.bf16.mxu0 %v613_v12 }
  0x29   : > { %590 = vmatpush3.bf16.msra.mxu0 %v613_v12 }
  0x2c   : > { %592 = vmatmul.mubr.bf16.vlgmr.msra.gmra.mxu0 %v615_v13 }
  0x89   : > { %v393_v14 = vpop.permute.xlu0 %392 }
  0x8a   : > { %v403_v18 = vpop.permute.xlu1 %402 }
  0x8d   : > { %v398_v21 = vpop.permute.xlu0 %397 }
  0xec   : > { %v593_v15 = vpop.f32.mrf.mxu0 }
  0xed   : > { %v559_v16 = vpack.c.bf16 %v593_v15, %v593_v15  ;;  %v407_v23 = vmul.f32 %v593_v15, %v403_v18 }
  0xee   : > { %v357_v17 = vpop.f32.mrf.mxu0 }
  0xef   : > { %386 = vst [vmem:[%s237_s28 + $0x8] sm:$0xf] %v559_v16  ;;  %v405_v20 = vmul.f32 %v393_v14, %v357_v17  ;;  %v419_v29 = vmul.f32 %v407_v23, %v407_v23 }
  0xf0   : > { %v594_v19 = vpop.f32.mrf.mxu0 }
  0xf1   : > { %v417_v26 = vmul.f32 %v405_v20, %v405_v20 }
  0xf2   : > { %v360_v22 = vpop.f32.mrf.mxu0 }
  0xf3   : > { %v563_v24 = vpack.c.bf16 %v360_v22, %v357_v17  ;;  %v406_v25 = vmul.f32 %v398_v21, %v360_v22 }
  0xf5   : > { %564 = vst [vmem:[%s237_s28] sm:$0xff] %v563_v24   ;;  %v408_v27 = vadd.f32 %v406_v25, %v405_v20  ;;  %v418_v28 = vmul.f32 %v406_v25, %v406_v25 }
  0xf7   : > { %v409_v30 = vadd.f32 %v408_v27, %v407_v23  ;;  %v420_v31 = vadd.f32 %v418_v28, %v417_v26 }
  0xf9   : > { %v410_v32 = vrot.slane %v409_v30, 4  ;;  %v421_v33 = vadd.f32 %v420_v31, %v419_v29 }
  0xfb   : > { %v411_v34 = vadd.f32 %v410_v32, %v409_v30  ;;  %v422_v35 = vrot.slane %v421_v33, 4 }
  0xfd   : > { %v412_v36 = vrot.slane %v411_v34, 2  ;;  %v423_v37 = vadd.f32 %v422_v35, %v421_v33 }
  0xff   : > { %v413_v38 = vadd.f32 %v412_v36, %v411_v34  ;;  %v424_v39 = vrot.slane %v423_v37, 2 }
 0x101   : > { %v414_v40 = vrot.slane %v413_v38, 1  ;;  %v425_v41 = vadd.f32 %v424_v39, %v423_v37 }
 0x103   : > { %v415_v42 = vadd.f32 %v414_v40, %v413_v38  ;;  %v426_v43 = vrot.slane %v425_v41, 1 }
 0x105   : > { %416 = vst [vmem:[%s241_s29] sm:$0x1] %v415_v42  ;;  %v427_v44 = vadd.f32 %v426_v43, %v425_v41 }
 0x107   : > { %428 = vst [vmem:[%s244_s7] sm:$0x1] %v427_v44 }
 0x108 PF: > { %s16_s18 = sadd.s32 1, %s622_s18  }
 0x109   : > { %p13_p5 = scmp.ge.s32.totalorder %s16_s18, 5  }
 0x10b   :  { %15 = sbr.rel (!%p13_p5) target bundleno = 1 (0x1), region = 86 }

</bundles_post_ra>
